<compile_context>
chip_gen: v7x
topology: tpu7x:2x2x1
jax: 0.10.0
libtpu: 0.0.40
codegen_flags: <defaults>
</compile_context>

<pallas_src>
import functools

import numpy as np
import jax
import jax.numpy as jnp
from jax.experimental import pallas as pl
from jax.experimental.pallas import tpu as pltpu


def _round_up(n, m):
    return ((n + m - 1) // m) * m


def _vmem_limit_bytes():
    """Scoped-VMEM limit derived from the chip: ~3/4 of physical VMEM, capped
    at 96 MiB (v5e/v6e: 96 MiB, v7x: 48 MiB); conservative 32 MiB fallback."""
    try:
        cap = int(pltpu.get_tpu_info().vmem_capacity_bytes)
    except Exception:  # query unsupported on this backend -> safe default
        return 32 * 1024 * 1024
    return max(32 * 1024 * 1024, min((cap * 3) // 4, 96 * 1024 * 1024))


def multifm_kernel(idx_ref, tab_ref, ssq_ref, bias_ref, w_ref, out_ref, *,
                   embed_dims, num_fields, total_pad, group_offsets):
    # idx_ref : (F, Bt)             int32  global vocab index per (field, sample)
    # tab_ref : (R_pad, total_pad)  bf16   per-FM 8-aligned groups [emb_k^T ; lin_k]
    # ssq_ref : (K_pad, total_pad)  f32    row k = per-vocab sum_d emb_k[:, d]^2
    # bias_ref: (K,)                f32    SMEM  per-FM linear bias
    # w_ref   : (K,)                f32    SMEM  MultiFM mixing weights
    # out_ref : (1, Bt)             f32    lane-dense output block
    bt = out_ref.shape[1]

    # Multi-hot matrix (vocab on sublanes, batch on lanes).  Fields map to
    # disjoint vocab ranges, so summing per-field one-hots reproduces the
    # embedding gather exactly.  Accumulate in int32; convert to float once
    # (v5e-friendly: no bf16 VPU arithmetic, single convert chain).
    ids = idx_ref[...]                                               # (F, Bt)
    vocab = jax.lax.broadcasted_iota(jnp.int32, (total_pad, bt), 0)  # vocab id / sublane
    cnt = (vocab == ids[0:1, :]).astype(jnp.int32)
    for f in range(1, num_fields):                                   # static unroll
        cnt = cnt + (vocab == ids[f:f + 1, :]).astype(jnp.int32)     # (total_pad, Bt)
    mh_f32 = cnt.astype(jnp.float32)
    mh_bf = mh_f32.astype(jnp.bfloat16)          # entries are 0/1: exact in bf16

    # One bf16 MXU matmul = embedding gather + sum over fields for every
    # per-vocab parameter row (all embedding dims + the per-FM linear weights).
    # (For arbitrary non-bf16-representable f32 params, hi/lo-split the table
    #  or raise precision instead.)
    s = jnp.dot(tab_ref[...], mh_bf,
                preferred_element_type=jnp.float32)                  # (R_pad, Bt)

    # Tiny resident matmul (K_pad rows) producing sum_{f,d} e^2 per FM at f32
    # precision; replaces the former per-K VPU multiply + XLU vocab reduction.
    ssq_s = jnp.dot(ssq_ref[...], mh_f32,
                    preferred_element_type=jnp.float32,
                    precision=jax.lax.Precision.HIGHEST)             # (K_pad, Bt)

    acc = jnp.zeros((1, bt), jnp.float32)
    for k, dk in enumerate(embed_dims):                              # static unroll
        g = group_offsets[k]                                         # 8-aligned start
        sk = s[g:g + dk, :]                                          # (dk, Bt) = sum_f e
        square_of_sum = jnp.sum(sk * sk, axis=0, keepdims=True)      # (1, Bt)
        sum_of_square = ssq_s[k:k + 1, :]                            # (1, Bt)
        fm_term = 0.5 * (square_of_sum - sum_of_square)
        lin_term = s[g + dk:g + dk + 1, :]                           # (1, Bt)
        acc = acc + w_ref[k] * (fm_term + lin_term + bias_ref[k])

    out_ref[...] = jax.nn.sigmoid(acc)                               # (1, Bt)


def multifm_forward(x, offsets, emb_tables, lin_tables, bias, mixw, *,
                    block_b=2048):
    """x: (B, F) int32 categorical input. Returns sigmoid scores of shape (B,)."""
    B, F = x.shape
    K = len(emb_tables)
    embed_dims = tuple(int(t.shape[1]) for t in emb_tables)
    total = int(emb_tables[0].shape[0])
    total_pad = _round_up(total, 8)

    # TODO(synk): for realistic FM vocabularies (total >~ tens of thousands) the
    # one-hot-matmul design stops scaling (O(vocab*Bt) multi-hot + resident
    # table); switch to a gather-based kernel (scalar-prefetched indices with
    # pl.Element row BlockSpecs or manual make_async_copy gather) in that regime.

    # Pack every per-vocab parameter into one small resident bf16 matrix with
    # vocab on lanes.  Per-FM group = [emb_k^T (dk rows); lin_k (1 row)], each
    # group padded to an 8-row (sublane) boundary so in-kernel slices stay
    # tile-aligned views.
    blocks, group_offsets = [], []
    row = 0
    for t, lt in zip(emb_tables, lin_tables):
        dk = int(t.shape[1])
        group_offsets.append(row)
        grp = jnp.concatenate(
            [t.astype(jnp.float32).T, lt.astype(jnp.float32).reshape(1, total)],
            axis=0)                                                  # (dk+1, total)
        gp = _round_up(dk + 1, 8)
        grp = jnp.pad(grp, ((0, gp - (dk + 1)), (0, total_pad - total)))
        blocks.append(grp)
        row += gp
    packed = jnp.concatenate(blocks, axis=0).astype(jnp.bfloat16)    # (R_pad, total_pad)
    R_pad = row
    group_offsets = tuple(group_offsets)

    # Per-vocab sum_d emb^2 in f32 (vocab on lanes), consumed by a tiny
    # high-precision matmul inside the kernel.
    K_pad = _round_up(K, 8)
    ssq = jnp.stack([jnp.sum(t.astype(jnp.float32) ** 2, axis=1)
                     for t in emb_tables], axis=0)                   # (K, total)
    ssq = jnp.pad(ssq, ((0, K_pad - K), (0, total_pad - total)))

    # Global vocab index per (field, sample); batch goes on the lane axis.
    idx_t = (x.astype(jnp.int32) + offsets[None, :].astype(jnp.int32)).T   # (F, B)

    # Batch tile: large (per-grid-step overhead dominates at these sizes), but
    # capped so transient (total_pad x block_b) buffers stay modest, lane-dense
    # (multiple of 128), and clamped to give >= 2 grid steps when B >= 256 so
    # both v7x TensorCores get work.
    cap = max(128, ((8 * 1024 * 1024) // (8 * total_pad) // 128) * 128)
    block_b = min(block_b, cap)
    if B >= 256:
        block_b = min(block_b, _round_up(pl.cdiv(B, 2), 128))
    if block_b >= B:
        block_b = B                                        # full-dim block is legal
    else:
        block_b = max(128, (block_b // 128) * 128)         # keep lanes dense
    # NOTE: if B % block_b != 0, the tail block computes on out-of-range lanes;
    # those outputs are masked on store, so results stay correct.
    grid = (pl.cdiv(B, block_b),)

    kernel = functools.partial(
        multifm_kernel, embed_dims=embed_dims, num_fields=int(F),
        total_pad=int(total_pad), group_offsets=group_offsets)

    # packed / ssq are fully resident (constant index_map); they are tiny here,
    # so default double-buffering costs nothing.  For large vocabularies add
    # pipeline_mode=pl.Buffered(1) to those specs to drop the second buffer.
    out = pl.pallas_call(
        kernel,
        out_shape=jax.ShapeDtypeStruct((1, B), jnp.float32),
        grid=grid,
        in_specs=[
            pl.BlockSpec((F, block_b), lambda b: (0, b)),          # indices (streamed)
            pl.BlockSpec((R_pad, total_pad), lambda b: (0, 0)),    # bf16 params (resident)
            pl.BlockSpec((K_pad, total_pad), lambda b: (0, 0)),    # f32 ssq     (resident)
            pl.BlockSpec(memory_space=pltpu.MemorySpace.SMEM),     # bias     (K,)
            pl.BlockSpec(memory_space=pltpu.MemorySpace.SMEM),     # mix wts  (K,)
        ],
        out_specs=pl.BlockSpec((1, block_b), lambda b: (0, b)),    # lane-dense output
        compiler_params=pltpu.CompilerParams(
            dimension_semantics=("parallel",),                     # batch blocks independent
            vmem_limit_bytes=_vmem_limit_bytes()),
    )(idx_t, packed, ssq, bias.astype(jnp.float32), mixw.astype(jnp.float32))
    return out[0]


if __name__ == "__main__":
    key = jax.random.PRNGKey(0)

    field_dims = (5, 7, 11, 3)          # num_fields = 4, vocab total = 26
    embed_dims = (8, 16)                # K = 2 FM sub-models
    B = 256
    F = len(field_dims)
    K = len(embed_dims)
    total = int(sum(field_dims))

    offsets = jnp.asarray(
        np.concatenate(([0], np.cumsum(field_dims)[:-1])), jnp.int32)

    keys = jax.random.split(key, 2 * K + 1)

    # Synthetic categorical input x: (B, F) int32.
    xkeys = jax.random.split(keys[-1], F)
    x = jnp.stack(
        [jax.random.randint(xkeys[f], (B,), 0, field_dims[f], dtype=jnp.int32)
         for f in range(F)], axis=1)

    # Deterministic parameter init (torchfm shapes).  Values are rounded to
    # bf16-representable f32 so the in-kernel bf16 lookup matmul is bit-exact.
    emb_tables, lin_tables = [], []
    for k in range(K):
        dk = embed_dims[k]
        bound = float(np.sqrt(6.0 / (total + dk)))                 # xavier_uniform
        t = jax.random.uniform(keys[2 * k], (total, dk), jnp.float32, -bound, bound)
        emb_tables.append(t.astype(jnp.bfloat16).astype(jnp.float32))
        lt = 0.01 * jax.random.normal(keys[2 * k + 1], (total,), jnp.float32)
        lin_tables.append(lt.astype(jnp.bfloat16).astype(jnp.float32))
    bias = jnp.zeros((K,), jnp.float32)     # FeaturesLinear bias init
    mixw = jnp.ones((K,), jnp.float32)      # MultiFM.weights init

    out = jax.block_until_ready(
        multifm_forward(x, offsets, emb_tables, lin_tables, bias, mixw))

    # Pure-JAX reference (explicit gathers).
    idx = x + offsets[None, :]
    ys = []
    for k in range(K):
        e = emb_tables[k][idx]                                      # (B, F, dk)
        lin = lin_tables[k][idx]                                    # (B, F)
        sum_f = jnp.sum(e, axis=1)
        fm = 0.5 * jnp.sum(sum_f * sum_f - jnp.sum(e * e, axis=1), axis=-1)
        ys.append(jnp.sum(lin, axis=1) + bias[k] + fm)
    ref = jax.nn.sigmoid(sum(mixw[k] * ys[k] for k in range(K)))

    np.testing.assert_allclose(np.asarray(out), np.asarray(ref),
                               rtol=1e-5, atol=1e-5)
    assert out.shape == (B,)
    print("KERNEL_OK")
</pallas_src>

<mosaic_0001>
module attributes {stable_mosaic.version = 11 : i64} {
  func.func @multifm_kernel(%arg0: i32, %arg1: memref<4x128xi32, #tpu.memory_space<vmem>>, %arg2: memref<40x32xbf16, #tpu.memory_space<vmem>>, %arg3: memref<8x32xf32, #tpu.memory_space<vmem>>, %arg4: memref<2xf32, #tpu.memory_space<smem>>, %arg5: memref<2xf32, #tpu.memory_space<smem>>, %arg6: memref<1x128xf32, #tpu.memory_space<vmem>>) attributes {dimension_semantics = [#tpu.dimension_semantics<parallel>], iteration_bounds = array<i64: 2>, scalar_prefetch = 0 : i64, scratch_operands = 0 : i64, tpu.core_type = #tpu.core_type<tc>, window_params = [{transform_indices = @transform_0, window_bounds = array<i64: 4, 128>}, {pipeline_mode = #tpu.pipeline_mode<synchronous>, transform_indices = @transform_1, window_bounds = array<i64: 40, 32>}, {pipeline_mode = #tpu.pipeline_mode<synchronous>, transform_indices = @transform_2, window_bounds = array<i64: 8, 32>}, {transform_indices = @transform_3, window_bounds = array<i64: 2>}, {transform_indices = @transform_4, window_bounds = array<i64: 2>}, {transform_indices = @transform_5, window_bounds = array<i64: 1, 128>}]} {
    %c0 = arith.constant 0 : index
    %c0_0 = arith.constant 0 : index
    %0 = vector.load %arg1[%c0, %c0_0] : memref<4x128xi32, #tpu.memory_space<vmem>>, vector<4x128xi32>
    %1 = tpu.iota {dimensions = array<i32: 0>} : vector<32x128xi32>
    %2 = vector.extract_strided_slice %0 {offsets = [0, 0], sizes = [1, 128], strides = [1, 1]} : vector<4x128xi32> to vector<1x128xi32>
    %3 = vector.broadcast %2 : vector<1x128xi32> to vector<32x128xi32>
    %4 = arith.cmpi eq, %1, %3 : vector<32x128xi32>
    %5 = arith.extui %4 : vector<32x128xi1> to vector<32x128xi32>
    %6 = vector.extract_strided_slice %0 {offsets = [1, 0], sizes = [1, 128], strides = [1, 1]} : vector<4x128xi32> to vector<1x128xi32>
    %7 = vector.broadcast %6 : vector<1x128xi32> to vector<32x128xi32>
    %8 = arith.cmpi eq, %1, %7 : vector<32x128xi32>
    %9 = arith.extui %8 : vector<32x128xi1> to vector<32x128xi32>
    %10 = arith.addi %5, %9 : vector<32x128xi32>
    %11 = vector.extract_strided_slice %0 {offsets = [2, 0], sizes = [1, 128], strides = [1, 1]} : vector<4x128xi32> to vector<1x128xi32>
    %12 = vector.broadcast %11 : vector<1x128xi32> to vector<32x128xi32>
    %13 = arith.cmpi eq, %1, %12 : vector<32x128xi32>
    %14 = arith.extui %13 : vector<32x128xi1> to vector<32x128xi32>
    %15 = arith.addi %10, %14 : vector<32x128xi32>
    %16 = vector.extract_strided_slice %0 {offsets = [3, 0], sizes = [1, 128], strides = [1, 1]} : vector<4x128xi32> to vector<1x128xi32>
    %17 = vector.broadcast %16 : vector<1x128xi32> to vector<32x128xi32>
    %18 = arith.cmpi eq, %1, %17 : vector<32x128xi32>
    %19 = arith.extui %18 : vector<32x128xi1> to vector<32x128xi32>
    %20 = arith.addi %15, %19 : vector<32x128xi32>
    %21 = arith.sitofp %20 : vector<32x128xi32> to vector<32x128xf32>
    %22 = arith.truncf %21 : vector<32x128xf32> to vector<32x128xbf16>
    %c0_1 = arith.constant 0 : index
    %c0_2 = arith.constant 0 : index
    %23 = vector.load %arg2[%c0_1, %c0_2] : memref<40x32xbf16, #tpu.memory_space<vmem>>, vector<40x32xbf16>
    %cst = arith.constant dense<0.000000e+00> : vector<40x128xf32>
    %24 = tpu.matmul %23, %22, %cst {dimension_numbers = #tpu.dot_dimension_numbers<[1], [0], [0], [1], [0, 0, 1, 1], [], []>} : vector<40x32xbf16>, vector<32x128xbf16>, vector<40x128xf32> -> vector<40x128xf32>
    %c0_3 = arith.constant 0 : index
    %c0_4 = arith.constant 0 : index
    %25 = vector.load %arg3[%c0_3, %c0_4] : memref<8x32xf32, #tpu.memory_space<vmem>>, vector<8x32xf32>
    %cst_5 = arith.constant dense<0.000000e+00> : vector<8x128xf32>
    %26 = tpu.matmul %25, %21, %cst_5 {dimension_numbers = #tpu.dot_dimension_numbers<[1], [0], [0], [1], [0, 0, 1, 1], [], []>, precision = #tpu.contract_precision<fp32>} : vector<8x32xf32>, vector<32x128xf32>, vector<8x128xf32> -> vector<8x128xf32>
    %cst_6 = arith.constant 0.000000e+00 : f32
    %27 = vector.broadcast %cst_6 : f32 to vector<1x128xf32>
    %28 = vector.extract_strided_slice %24 {offsets = [0, 0], sizes = [8, 128], strides = [1, 1]} : vector<40x128xf32> to vector<8x128xf32>
    %29 = arith.mulf %28, %28 : vector<8x128xf32>
    %cst_7 = arith.constant dense<0.000000e+00> : vector<128xf32>
    %30 = vector.multi_reduction <add>, %29, %cst_7 [0] : vector<8x128xf32> to vector<128xf32>
    %31 = vector.shape_cast %30 : vector<128xf32> to vector<1x128xf32>
    %32 = vector.extract_strided_slice %26 {offsets = [0, 0], sizes = [1, 128], strides = [1, 1]} : vector<8x128xf32> to vector<1x128xf32>
    %33 = arith.subf %31, %32 : vector<1x128xf32>
    %cst_8 = arith.constant 5.000000e-01 : f32
    %34 = vector.broadcast %cst_8 : f32 to vector<1x128xf32>
    %35 = arith.mulf %34, %33 : vector<1x128xf32>
    %36 = vector.extract_strided_slice %24 {offsets = [8, 0], sizes = [1, 128], strides = [1, 1]} : vector<40x128xf32> to vector<1x128xf32>
    %c0_9 = arith.constant 0 : index
    %37 = memref.load %arg5[%c0_9] : memref<2xf32, #tpu.memory_space<smem>>
    %38 = arith.addf %35, %36 : vector<1x128xf32>
    %c0_10 = arith.constant 0 : index
    %39 = memref.load %arg4[%c0_10] : memref<2xf32, #tpu.memory_space<smem>>
    %40 = vector.broadcast %39 : f32 to vector<1x128xf32>
    %41 = arith.addf %38, %40 : vector<1x128xf32>
    %42 = vector.broadcast %37 : f32 to vector<1x128xf32>
    %43 = arith.mulf %42, %41 : vector<1x128xf32>
    %44 = arith.addf %27, %43 : vector<1x128xf32>
    %45 = vector.extract_strided_slice %24 {offsets = [16, 0], sizes = [16, 128], strides = [1, 1]} : vector<40x128xf32> to vector<16x128xf32>
    %46 = arith.mulf %45, %45 : vector<16x128xf32>
    %cst_11 = arith.constant dense<0.000000e+00> : vector<128xf32>
    %47 = vector.multi_reduction <add>, %46, %cst_11 [0] : vector<16x128xf32> to vector<128xf32>
    %48 = vector.shape_cast %47 : vector<128xf32> to vector<1x128xf32>
    %49 = vector.extract_strided_slice %26 {offsets = [1, 0], sizes = [1, 128], strides = [1, 1]} : vector<8x128xf32> to vector<1x128xf32>
    %50 = arith.subf %48, %49 : vector<1x128xf32>
    %cst_12 = arith.constant 5.000000e-01 : f32
    %51 = vector.broadcast %cst_12 : f32 to vector<1x128xf32>
    %52 = arith.mulf %51, %50 : vector<1x128xf32>
    %53 = vector.extract_strided_slice %24 {offsets = [32, 0], sizes = [1, 128], strides = [1, 1]} : vector<40x128xf32> to vector<1x128xf32>
    %c1 = arith.constant 1 : index
    %54 = memref.load %arg5[%c1] : memref<2xf32, #tpu.memory_space<smem>>
    %55 = arith.addf %52, %53 : vector<1x128xf32>
    %c1_13 = arith.constant 1 : index
    %56 = memref.load %arg4[%c1_13] : memref<2xf32, #tpu.memory_space<smem>>
    %57 = vector.broadcast %56 : f32 to vector<1x128xf32>
    %58 = arith.addf %55, %57 : vector<1x128xf32>
    %59 = vector.broadcast %54 : f32 to vector<1x128xf32>
    %60 = arith.mulf %59, %58 : vector<1x128xf32>
    %61 = arith.addf %44, %60 : vector<1x128xf32>
    %62 = arith.negf %61 : vector<1x128xf32>
    %63 = math.exp %62 : vector<1x128xf32>
    %cst_14 = arith.constant 1.000000e+00 : f32
    %64 = vector.broadcast %cst_14 : f32 to vector<1x128xf32>
    %65 = arith.addf %64, %63 : vector<1x128xf32>
    %66 = arith.divf %64, %65 : vector<1x128xf32>
    %c0_15 = arith.constant 0 : index
    %c0_16 = arith.constant 0 : index
    %67 = vector.load %arg6[%c0_15, %c0_16] : memref<1x128xf32, #tpu.memory_space<vmem>>, vector<1x128xf32>
    tpu.vector_store %arg6[%c0_15, %c0_16], %66 {strides = array<i32>} : memref<1x128xf32, #tpu.memory_space<vmem>>, vector<1x128xf32>,
    return
  }
  func.func @transform_0(%arg0: i32) -> (i32, i32) {
    %c0_i32 = arith.constant 0 : i32
    %c0_i32_0 = arith.constant 0 : i32
    return %c0_i32, %arg0 : i32, i32
  }
  func.func @transform_1(%arg0: i32) -> (i32, i32) {
    %c0_i32 = arith.constant 0 : i32
    %c0_i32_0 = arith.constant 0 : i32
    %c0_i32_1 = arith.constant 0 : i32
    return %c0_i32, %c0_i32_0 : i32, i32
  }
  func.func @transform_2(%arg0: i32) -> (i32, i32) {
    %c0_i32 = arith.constant 0 : i32
    %c0_i32_0 = arith.constant 0 : i32
    %c0_i32_1 = arith.constant 0 : i32
    return %c0_i32, %c0_i32_0 : i32, i32
  }
  func.func @transform_3(%arg0: i32) -> i32 {
    %c0_i32 = arith.constant 0 : i32
    %c0_i32_0 = arith.constant 0 : i32
    return %c0_i32 : i32
  }
  func.func @transform_4(%arg0: i32) -> i32 {
    %c0_i32 = arith.constant 0 : i32
    %c0_i32_0 = arith.constant 0 : i32
    return %c0_i32 : i32
  }
  func.func @transform_5(%arg0: i32) -> (i32, i32) {
    %c0_i32 = arith.constant 0 : i32
    %c0_i32_0 = arith.constant 0 : i32
    return %c0_i32, %arg0 : i32, i32
  }
}

</mosaic_0001>

<bundles_post_ra>
// kernel: tpu_custom_call.1
= control target key start
LH: loop header
LB: loop body
LE: loop exit
PB: predicated region body
PF: predicated region fallthrough
CT: control target
= control target key end

     0   :  { %10 = vsyncpa [#allocation4], 0  ;;  %s1617_s0 = inlined_call_operand.vmem [shape: s32[4,256], index: 0, kind: input, shape index: {}]   ;;  %s1618_s1 = inlined_call_operand.vmem [shape: bf16[40,32], index: 1, kind: input, shape index: {}]   ;;  %s1619_s2 = inlined_call_operand.vmem [shape: f32[8,32], index: 2, kind: input, shape index: {}]   ;;  %s1620_s3 = inlined_call_operand.vmem [shape: f32[2], index: 3, kind: input, shape index: {}]   ;;  %s1621_s4 = inlined_call_operand.vmem [shape: f32[2], index: 4, kind: input, shape index: {}]   ;;  %s1622_s5 = inlined_call_operand.hbm [shape: f32[1,256], index: 5, kind: output, shape index: {}]  }
   0x1   :  { %11 = vsyncpa [#allocation6], 0 }
   0x2   :  { %12 = vsyncpa [#allocation3], 0 }
   0x3   :  { %14 = vsyncpa [#allocation3 + $0x1], 0  ;;  %s1424_s18 = smov 0   ;;  %s1426_s19 = smov 0  }
   0x4   :  { %s1428_s20 = smov 0   ;;  %s1430_s21 = smov 0  }
   0x5 LB: > { %s1445_s22 = sadd.s32 4294967295, %s1385_s21   ;;  %s1031_s23 = sadd.s32 4294967294, %s1385_s21   ;;  %s1385_s21 = sphi %s1430_s21, %s1640_s21   ;;  %s1381_s20 = sphi %s1428_s20, %s1639_s20   ;;  %s1377_s19 = sphi %s1426_s19, %s1638_s19   ;;  %s1373_s18 = sphi %s1424_s18, %s1637_s18  }
   0x6   : > { %s1449_s24 = sadd.s32 1, %s1385_s21   ;;  %s137_s25 = sadd.s32 1, %s1381_s20 }
   0x7   : > { %s134_s26 = ssub.s32 %s1385_s21, %s1449_s24  ;;  %p147_p0 = scmp.ne.s32.totalorder %s1381_s20, %s1377_s19 }
   0x8   : > { %p135_p1 = scmp.eq.s32.totalorder %s134_s26, 0  ;;  %p148_p2 = scmp.eq.s32.totalorder %s1445_s22, 1 }
   0x9   : > { %p153_p3 = scmp.ne.s32.totalorder %s1377_s19, %s1373_s18  ;;  %p154_p4 = scmp.eq.s32.totalorder %s1031_s23, 1 }
   0xa   : > { %s1460_s27 = scalar_select %p135_p1, %s1381_s20, %s137_s25  }
   0xb   : > { %p1462_p5 = por %p148_p2, %p147_p0  ;;  %p1466_p6 = por %p154_p4, %p153_p3 }
   0xc   : > { %p1032_p7 = scmp.ge.s32.totalorder %s1385_s21, 1  ;;  %p161_p8 = scmp.lt.s32.totalorder %s1385_s21, 3 }
   0xd   : > { %s1626_s28 = scalar_select %p1462_p5, 1, 0 }
   0xe   : > { %s1627_s29 = scalar_select %p1466_p6, 1, 0 }
   0xf   : > { %p1623_p9 = scmp.eq.s32.totalorder %s1445_s22, 0  ;;  %p1473_p10 = pnand %p1032_p7, %p161_p8 }
  0x10   : > { %s180_s8 = sshll.u32 %s1620_s3, 4  ;;  %s191_s11 = sshll.u32 %s1621_s4, 4  ;;  %s181_s8 = int_to_ptr.vmem [resolvable:$true] %s180_s8  ;;  %s192_s11 = int_to_ptr.vmem [resolvable:$true] %s191_s11 }
  0x11   : > { %s1628_s30 = scalar_select %p1473_p10, 1, 0 }
  0x12   : > { %p1224_p11 = pneg %p1473_p10  ;;  %s1285_s13 = scalar_lea.vmem %s181_s8, 16 }
  0x13   : > { %p1286_p13 = scmp.ne.s32.totalorder %s181_s8, %s1285_s13  ;;  %p1293_p3 = scmp.lt.s32.totalorder %s181_s8, %s181_s8 }
  0x14   : > { %p1487_p12 = pnand %p1623_p9, %p1224_p11  ;;  %p1294_p4 = scmp.lt.s32.totalorder %s1285_s13, %s1285_s13 }
  0x16   : > { %p1287_p0 = pneg %p1487_p12  ;;  %p1295_p7 = por %p1294_p4, %p1293_p3 }
  0x18   : > { %p1288_p1 = pnand %p1287_p0, %p1286_p13 }
  0x1a   : > { %p1289_p2 = pneg %p1288_p1 }
  0x1c   : > { %p1296_p8 = pnand %p1295_p7, %p1289_p2 }
  0x1e   : > { %1299 = shalt.err (!%p1296_p8)
}
  0x1f   : > { %s1387_s14 = smov [#allocation2]   ;;  %s1300_s15 = scalar_lea.vmem %s192_s11, 16 }
  0x20   : > { %1227 = dma.vmem_to_smem (!%p1487_p12), %s181_s8, 16, %s1387_s14, [#allocation4]  }
  0x21   : > { %p1301_p11 = scmp.ne.s32.totalorder %s192_s11, %s1300_s15  ;;  %p1308_p5 = scmp.lt.s32.totalorder %s192_s11, %s192_s11 }
  0x22   : > { %p1309_p10 = scmp.lt.s32.totalorder %s1300_s15, %s1300_s15 }
  0x23   : > { %p1303_p9 = pnand %p1301_p11, %p1287_p0 }
  0x24   : > { %p1310_p13 = por %p1309_p10, %p1308_p5 }
  0x25   : > { %p1304_p6 = pneg %p1303_p9 }
  0x27   : > { %p1311_p1 = pnand %p1310_p13, %p1304_p6 }
  0x29   : > { %1314 = shalt.err (!%p1311_p1)
}
  0x2a   : > { %s1388_s16 = smov [#allocation5]   ;;  %p1630_p2 = scmp.ne.s32.totalorder %s1628_s30, 0 }
  0x2b   : > { %1230 = dma.vmem_to_smem (!%p1487_p12), %s192_s11, 16, %s1388_s16, [#allocation6]  }
  0x2c   : > { %211 = sbr.rel (%p1630_p2) target bundleno = 399 (0x18f), region = 40  ;;  %p1631_p3 = scmp.eq.s32.totalorder (!%p1630_p2), %s1445_s22, 0 }
  0x33   : > { %1360 = dma.done.wait (%p1631_p3), [#allocation4], 16   ;;  %p1632_p4 = pmov %p1631_p3 }
  0x34   : > { %p1633_p9 = pmov %p1631_p3 }
  0x35   : > { %1362 = vsyncadd (%p1632_p4), [#allocation4], 4294967280 }
  0x36   : > { %1364 = dma.done.wait (%p1633_p9), [#allocation6], 16   ;;  %p1634_p5 = pmov %p1631_p3 }
  0x38   : > { %1366 = vsyncadd (%p1634_p5), [#allocation6], 4294967280 }
  0x39   : > { %221 = sfence }
  0x3a   : > { %p242_p6 = scmp.lt.s32.totalorder %s1445_s22, 1  ;;  %v248_v0 = vlaneseq  ;;  %v1389_v1 = vmov 0.0|0.0   ;;  %v1390_v2 = vmov 0.0   ;;  %vm1391_vm0 = vmmov 0   ;;  %s903_s14 = sld [smem:[#allocation2]] }
  0x3b   : > { %1175 = vmatprep.subr.bf16.mxu1 %v1389_v1  ;;  %1087 = vmatprep.subr.bf16.mxu0 %v1390_v2  ;;  %v1392_v16 = vmov 0   ;;  %s1047_s15 = sld [smem:[#allocation2 + $0x1]]  ;;  %s1049_s25 = sshll.u32 %s1445_s22, 4 }
  0x3c   : > { %s243_s17 = scalar_select %p242_p6, %s1445_s22, 1  ;;  %v249_v3 = vshrl.u32 %v248_v0, 7  ;;  %1122 = vmatprep.mubr.msk.f32.mxu1 %vm1391_vm0, %v1390_v2  ;;  %1091 = vmatprep.mubr.msk.bf16.mxu0 %vm1391_vm0, %v1390_v2  ;;  %v1278_v0 = vld [vmem:[%s1618_s1] sm:$0xff]  }
  0x3d   : > { %s1046_s16 = sld [smem:[#allocation5 + $0x1]]  ;;  %s1575_s8 = scalar_lea.hbm %s1622_s5, %s1049_s25 }
  0x3e   : > { %s1039_s23 = sshll.u32 %s243_s17, 2  ;;  %v255_v4 = vsub.s32 0, %v249_v3  ;;  %v267_v5 = vsub.s32 1, %v249_v3  ;;  %v283_v6 = vsub.s32 2, %v249_v3  ;;  %v250_v7 = vadd.s32 8, %v249_v3  ;;  %s901_s17 = sld [smem:[#allocation5]] }
  0x3f   : > { %s245_s30 = scalar_lea.vmem %s1617_s0, %s1039_s23  ;;  %v299_v8 = vsub.s32 3, %v249_v3  ;;  %v251_v14 = vadd.s32 16, %v249_v3  ;;  %v252_v15 = vadd.s32 24, %v249_v3  ;;  %s240_s23 = sand.u32 1, %s1377_s19  }
  0x40   : > { %v247_v9 = vld [vmem:[%s245_s30] sm:$0xf]  ;;  %s241_s26 = scalar_lea.vmem [#allocation7], %s240_s23  ;;  %s942_s9 = scalar_lea.sflag [#allocation3], %s240_s23 }
  0x41   : > { %v256_v10 = vrot.slane %v247_v9, %v255_v4  ;;  %v268_v11 = vrot.slane %v247_v9, %v267_v5  ;;  %v284_v12 = vrot.slane %v247_v9, %v283_v6  ;;  %v300_v13 = vrot.slane %v247_v9, %v299_v8  ;;  %v403_v8 = vld [vmem:[%s1619_s2] sm:$0xff]  ;;  %s954_s30 = sshll.u32 %s241_s26, 4  ;;  %p1635_p12 = scmp.ne.s32.totalorder %s1626_s28, 0  ;;  %s1577_s30 = int_to_ptr.vmem [resolvable:$true] %s954_s30 }
  0x42   : > { %s1315_s10 = scalar_lea.vmem %s1577_s30, 16  ;;  %s1393_s22 = smov [#allocation7]  }
  0x43   : > { %vm257_vm1 = vcmp.eq.s32.totalorder %v249_v3, %v256_v10  ;;  %vm258_vm2 = vcmp.eq.s32.totalorder %v250_v7, %v256_v10  ;;  %vm269_vm3 = vcmp.eq.s32.totalorder %v249_v3, %v268_v11  ;;  %vm270_vm4 = vcmp.eq.s32.totalorder %v250_v7, %v268_v11  ;;  %p1316_p10 = scmp.ne.s32.totalorder %s1577_s30, %s1315_s10  ;;  %s1319_s11 = sshll.u32 %s1393_s22, 4  ;;  %s1320_s11 = int_to_ptr.vmem [resolvable:$false] %s1319_s11 }
  0x44   : > { %v261_v17 = vsel %vm257_vm1, 1, %v1392_v16  ;;  %v262_v18 = vsel %vm258_vm2, 1, %v1392_v16  ;;  %v273_v19 = vsel %vm269_vm3, 1, %v1392_v16  ;;  %v274_v20 = vsel %vm270_vm4, 1, %v1392_v16  ;;  %s1321_s12 = scalar_lea.vmem %s1320_s11, 32  ;;  %p1322_p8 = scmp.lt.s32.totalorder %s1577_s30, %s1320_s11 }
  0x45   : > { %v277_v21 = vadd.s32 %v273_v19, %v261_v17  ;;  %v278_v22 = vadd.s32 %v274_v20, %v262_v18  ;;  %vm285_vm5 = vcmp.eq.s32.totalorder %v249_v3, %v284_v12  ;;  %vm286_vm6 = vcmp.eq.s32.totalorder %v250_v7, %v284_v12  ;;  %p1317_p0 = pnand %p1316_p10, %p1635_p12  ;;  %p1323_p11 = scmp.lt.s32.totalorder %s1321_s12, %s1315_s10 }
  0x46   : > { %v289_v23 = vsel %vm285_vm5, 1, %v1392_v16  ;;  %v290_v24 = vsel %vm286_vm6, 1, %v1392_v16  ;;  %vm301_vm7 = vcmp.eq.s32.totalorder %v249_v3, %v300_v13  ;;  %vm302_vm8 = vcmp.eq.s32.totalorder %v250_v7, %v300_v13 }
  0x47   : > { %v293_v25 = vadd.s32 %v289_v23, %v277_v21  ;;  %v294_v26 = vadd.s32 %v290_v24, %v278_v22  ;;  %v305_v27 = vsel %vm301_vm7, 1, %v1392_v16  ;;  %v306_v28 = vsel %vm302_vm8, 1, %v1392_v16  ;;  %v1280_v21 = vld [vmem:[%s1618_s1 + $0x10] ss:$0 sps:$4 sm:$0xff]   ;;  %p1318_p7 = pneg %p1317_p0  ;;  %p1324_p13 = por %p1323_p11, %p1322_p8 }
  0x48   : > { %vm259_vm9 = vcmp.eq.s32.totalorder %v251_v14, %v256_v10  ;;  %vm260_vm10 = vcmp.eq.s32.totalorder %v252_v15, %v256_v10  ;;  %vm271_vm11 = vcmp.eq.s32.totalorder %v251_v14, %v268_v11  ;;  %vm272_vm12 = vcmp.eq.s32.totalorder %v252_v15, %v268_v11 }
  0x49   : > { %v309_v29 = vadd.s32 %v305_v27, %v293_v25  ;;  %v310_v30 = vadd.s32 %v306_v28, %v294_v26  ;;  %v263_v31 = vsel %vm259_vm9, 1, %v1392_v16  ;;  %v264_v32 = vsel %vm260_vm10, 1, %v1392_v16  ;;  %p1325_p1 = pnand %p1324_p13, %p1318_p7 }
  0x4a   : > { %v275_v33 = vsel %vm271_vm11, 1, %v1392_v16  ;;  %v276_v34 = vsel %vm272_vm12, 1, %v1392_v16  ;;  %vm287_vm13 = vcmp.eq.s32.totalorder %v251_v14, %v284_v12  ;;  %vm288_vm14 = vcmp.eq.s32.totalorder %v252_v15, %v284_v12 }
  0x4b   : > { %v313_v35 = vcvt.s32.f32 %v309_v29  ;;  %v314_v36 = vcvt.s32.f32 %v310_v30  ;;  %v279_v37 = vadd.s32 %v275_v33, %v263_v31  ;;  %v280_v38 = vadd.s32 %v276_v34, %v264_v32 }
  0x4c   : > { %v291_v39 = vsel %vm287_vm13, 1, %v1392_v16  ;;  %v292_v40 = vsel %vm288_vm14, 1, %v1392_v16  ;;  %vm303_vm15 = vcmp.eq.s32.totalorder %v251_v14, %v300_v13  ;;  %vm304_vm1 = vcmp.eq.s32.totalorder %v252_v15, %v300_v13  ;;  %v1279_v14 = vld [vmem:[%s1618_s1 + $0x8] sm:$0xff]  }
  0x4d   : > { %v408_v41 = vand.u32 4294901760, %v313_v35  ;;  %v411_v42 = vand.u32 4294901760, %v314_v36  ;;  %v317_v43 = vpack.c.bf16 %v314_v36, %v313_v35  ;;  %v295_v44 = vadd.s32 %v291_v39, %v279_v37 }
  0x4e   : > { %v296_v45 = vadd.s32 %v292_v40, %v280_v38  ;;  %v307_v46 = vsel %vm303_vm15, 1, %v1392_v16  ;;  %v308_v47 = vsel %vm304_vm1, 1, %v1392_v16  ;;  %vm337_vm2 = vcmask 261120  }
  0x4f   : > { %v1518_v48 = vsub.f32 %v313_v35, %v408_v41  ;;  %v1520_v49 = vsub.f32 %v314_v36, %v411_v42  ;;  %1088 = vmatpush3.bf16.msra.mxu0 %v317_v43  ;;  %v311_v50 = vadd.s32 %v307_v46, %v295_v44  ;;  %v1170_v9 = vpack.c.bf16 %v411_v42, %v408_v41 }
  0x50   : > { %1089 = vmatprep.subr.bf16.mxu0 %v1390_v2  ;;  %v312_v51 = vadd.s32 %v308_v47, %v296_v45  ;;  %v405_v13 = vsel %vm337_vm2, %v403_v8, 0  ;;  %v906_v8 = vstv %s901_s17 }
  0x51   : > { %v489_v52 = vand.u32 4294901760, %v1518_v48  ;;  %v496_v53 = vand.u32 4294901760, %v1520_v49  ;;  %v315_v54 = vcvt.s32.f32 %v311_v50  ;;  %v476_v17 = vand.u32 4294901760, %v405_v13 }
  0x52   : > { %v316_v55 = vcvt.s32.f32 %v312_v51  ;;  %v1182_v18 = vpack.c.bf16 %v1520_v49, %v1518_v48 }
  0x53   : > { %v490_v56 = vsub.f32 %v1518_v48, %v489_v52  ;;  %v497_v57 = vsub.f32 %v1520_v49, %v496_v53  ;;  %v414_v58 = vand.u32 4294901760, %v315_v54  ;;  %v477_v20 = vsub.f32 %v405_v13, %v476_v17 }
  0x54   : > { %v417_v59 = vand.u32 4294901760, %v316_v55  ;;  %v318_v60 = vpack.c.bf16 %v316_v55, %v315_v54  ;;  %v1194_v25 = vpack.c.bf16 %v496_v53, %v489_v52 }
  0x55   : > { %v491_v61 = vand.u32 4294901760, %v490_v56  ;;  %v498_v62 = vand.u32 4294901760, %v497_v57  ;;  %v502_v63 = vsub.f32 %v315_v54, %v414_v58  ;;  %v478_v22 = vand.u32 4294901760, %v477_v20 }
  0x56   : > { %v509_v3 = vsub.f32 %v316_v55, %v417_v59  ;;  %1090 = vmatpush3.bf16.msra.mxu0 %v318_v60  ;;  %v1173_v15 = vpack.c.bf16 %v417_v59, %v414_v58 }
  0x57   : > { %v1176_v4 = vpack.c.bf16 %v498_v62, %v491_v61  ;;  %v503_v5 = vand.u32 4294901760, %v502_v63  ;;  %1169 = vmatprep.subr.bf16.mxu0 %v1389_v1  ;;  %v479_v23 = vsub.f32 %v477_v20, %v478_v22 }
  0x58   : > { %v510_v6 = vand.u32 4294901760, %v509_v3  ;;  %v1185_v19 = vpack.c.bf16 %v509_v3, %v502_v63 }
  0x59   : > { %1177 = vmatpush3.bf16.msra.mxu1 %v1176_v4  ;;  %v504_v7 = vsub.f32 %v502_v63, %v503_v5  ;;  %1092 = vmatmul.mubr.msk.bf16.vlgmr.msra.gmra.mrb[0].mxu0 %vm337_vm2, %v1278_v0  ;;  %v480_v24 = vand.u32 4294901760, %v479_v23  ;;  %v904_v63 = vstv %s903_s14  ;;  %v926_v0 = vstv %s1047_s15 }
  0x5a   : > { %1178 = vmatprep.subr.bf16.mxu1 %v1389_v1  ;;  %v511_v10 = vsub.f32 %v509_v3, %v510_v6  ;;  %1095 = vmatprep.mubr.msk.bf16.mxu0 %vm1391_vm0, %v1390_v2  ;;  %v1197_v26 = vpack.c.bf16 %v510_v6, %v503_v5  ;;  %v928_v5 = vstv %s1046_s16 }
  0x5b   : > { %v505_v11 = vand.u32 4294901760, %v504_v7  ;;  %1171 = vmatpush3.bf16.msra.mxu0 %v1170_v9 }
  0x5c   : > { %v512_v12 = vand.u32 4294901760, %v511_v10  ;;  %1172 = vmatprep.subr.bf16.mxu0 %v1389_v1 }
  0x5e   : > { %v1179_v16 = vpack.c.bf16 %v512_v12, %v505_v11 }
  0x5f   : > { %1174 = vmatpush3.bf16.msra.mxu0 %v1173_v15 }
  0x60   : > { %1180 = vmatpush3.bf16.msra.mxu1 %v1179_v16 }
  0x61   : > { %1181 = vmatprep.subr.bf16.mxu1 %v1389_v1  ;;  %1096 = vmatmul.mubr.msk.bf16.gmra.mrb[4].mxu0 %vm337_vm2, %v1279_v14 }
  0x62   : > { %1099 = vmatprep.mubr.msk.bf16.mxu0 %vm1391_vm0, %v1390_v2 }
  0x63   : > { %1123 = vmatmul.mubr.f32.vlgmr.msra.gmra.mrb[0].mxu1 %v476_v17 }
  0x64   : > { %1183 = vmatpush3.bf16.msra.mxu1 %v1182_v18  ;;  %1133 = vmatprep.mubr.msk.f32.mxu1 %vm1391_vm0, %v1390_v2 }
  0x65   : > { %1184 = vmatprep.subr.bf16.mxu1 %v1389_v1 }
  0x68   : > { %1186 = vmatpush3.bf16.msra.mxu1 %v1185_v19 }
  0x69   : > { %1187 = vmatprep.subr.bf16.mxu1 %v1389_v1  ;;  %1100 = vmatmul.mubr.msk.bf16.gmra.mrb[8].mxu0 %vm337_vm2, %v1280_v21 }
  0x6a   : > { %1111 = vmatprep.mubr.msk.f32.mxu0 %vm1391_vm0, %v1390_v2 }
  0x6b   : > { %1134 = vmatmul.mubr.f32.vlgmr.msra.gmra.mrb[0].mxu1 %v477_v20 }
  0x6c   : > { %1189 = vmatpush3.bf16.msra.mxu1 %v1170_v9  ;;  %1144 = vmatprep.mubr.msk.f32.mxu1 %vm1391_vm0, %v1390_v2 }
  0x6d   : > { %1190 = vmatprep.subr.bf16.mxu1 %v1389_v1 }
  0x70   : > { %1192 = vmatpush3.bf16.msra.mxu1 %v1173_v15 }
  0x71   : > { %1193 = vmatprep.subr.bf16.mxu1 %v1389_v1  ;;  %1112 = vmatmul.mubr.f32.vlgmr.msra.gmra.mrb[12].mxu0 %v480_v24 }
  0x73   : > { %1145 = vmatmul.mubr.f32.vlgmr.msra.gmra.mrb[0].mxu1 %v478_v22 }
  0x74   : > { %1195 = vmatpush3.bf16.msra.mxu1 %v1194_v25  ;;  %1155 = vmatprep.mubr.msk.f32.mxu1 %vm1391_vm0, %v1390_v2 }
  0x75   : > { %1196 = vmatprep.subr.bf16.mxu1 %v1389_v1 }
  0x78   : > { %1198 = vmatpush3.bf16.msra.mxu1 %v1197_v26 }
  0x79   : > { %1199 = vmatprep.subr.bf16.mxu1 %v1389_v1 }
  0x7b   : > { %1156 = vmatmul.mubr.f32.vlgmr.msra.gmra.mrb[0].mxu1 %v476_v17 }
  0x7c   : > { %1201 = vmatpush3.bf16.msra.mxu1 %v1170_v9  ;;  %1166 = vmatprep.mubr.msk.f32.mxu1 %vm1391_vm0, %v1390_v2 }
  0x7d   : > { %1202 = vmatprep.subr.bf16.mxu1 %v1389_v1 }
  0x80   : > { %1204 = vmatpush3.bf16.msra.mxu1 %v1173_v15 }
  0x83   : > { %1167 = vmatmul.mubr.f32.vlgmr.msra.gmra.mrb[0].mxu1 %v476_v17 }
 0x12c   : > { %v381_v27 = vpop.f32.mrb[0].mxu0 }
 0x12d   : > { %v1093_v28 = vpop.f32.mrb[1].mxu0  ;;  %v892_v41 = vmul.f32 %v381_v27, %v381_v27 }
 0x12e   : > { %v384_v29 = vpop.f32.mrb[2].mxu0 }
 0x12f   : > { %v1094_v30 = vpop.f32.mrb[3].mxu0  ;;  %v893_v42 = vrot.slane %v892_v41, 4 }
 0x131   : > { %v894_v45 = vadd.f32 %v893_v42, %v892_v41 }
 0x133   : > { %v895_v47 = vrot.slane %v894_v45, 2 }
 0x134   : > { %v389_v31 = vpop.f32.mrb[4].mxu0 }
 0x135   : > { %v909_v32 = vmul.f32 %v389_v31, %v389_v31  ;;  %v1097_v33 = vpop.f32.mrb[5].mxu0  ;;  %v896_v49 = vadd.f32 %v895_v47, %v894_v45 }
 0x136   : > { %v392_v34 = vpop.f32.mrb[6].mxu0 }
 0x137   : > { %v910_v35 = vmul.f32 %v392_v34, %v392_v34  ;;  %v1098_v36 = vpop.f32.mrb[7].mxu0  ;;  %v897_v51 = vrot.slane %v896_v49, 1 }
 0x139   : > { %v911_v37 = vadd.f32 %v910_v35, %v909_v32  ;;  %v898_v55 = vadd.f32 %v897_v51, %v896_v49 }
 0x13b   : > { %v912_v1 = vrot.slane %v911_v37, 4 }
 0x13c   : > { %v397_v38 = vpop.f32.mrb[8].mxu0 }
 0x13d   : > { %v1101_v39 = vpop.f32.mrb[9].mxu0  ;;  %v913_v46 = vadd.f32 %v912_v1, %v911_v37  ;;  %v922_v60 = vrot.slane %v397_v38, 7 }
 0x13e   : > { %v400_v40 = vpop.f32.mrb[10].mxu0 }
 0x13f   : > { %v1102_v2 = vpop.f32.mrb[11].mxu0  ;;  %v914_v48 = vrot.slane %v913_v46, 2 }
 0x141   : > { %v915_v50 = vadd.f32 %v914_v48, %v913_v46 }
 0x143   : > { %v916_v52 = vrot.slane %v915_v50, 1 }
 0x144   : > { %v482_v43 = vpop.f32.mrb[12].mxu0 }
 0x145   : > { %v1113_v44 = vpop.f32.mrb[13].mxu0  ;;  %v917_v56 = vadd.f32 %v916_v52, %v915_v50 }
 0x156   : > { %v888_v53 = vpop.f32.mrb[0].mxu1 }
 0x157   : > { %v1205_v54 = vadd.f32 %v888_v53, %v482_v43  ;;  %v1168_v57 = vpop.f32.mrb[1].mxu1 }
 0x159   : > { %v899_v58 = vsub.f32 %v898_v55, %v1205_v54  ;;  %v918_v59 = vsub.f32 %v917_v56, %v1205_v54 }
 0x15b   : > { %v900_v61 = vmul.f32 0.5, %v899_v58  ;;  %v919_v62 = vmul.f32 0.5, %v918_v59 }
 0x15d   : > { %v902_v3 = vadd.f32 %v900_v61, %v384_v29  ;;  %v924_v4 = vadd.f32 %v922_v60, %v919_v62 }
 0x15f   : > { %v905_v6 = vadd.f32 %v904_v63, %v902_v3  ;;  %v927_v7 = vadd.f32 %v926_v0, %v924_v4 }
 0x161   : > { %v929_v9 = vmul.f32 %v928_v5, %v927_v7  ;;  %v907_v10 = vmul.f32 %v906_v8, %v905_v6 }
 0x163   : > { %v931_v11 = vrot.slane %v929_v9, 1 }
 0x165   : > { %v933_v12 = vadd.f32 %v931_v11, %v907_v10 }
 0x167   : > { %v1048_v13 = vmul.f32 -1.442695, %v933_v12 }
 0x169   : > { %1281 = vpow2.f32 %v1048_v13 }
 0x173   : > { %v1282_v14 = vpop.eup %1281 }
 0x174   : > { %v937_v15 = vadd.f32 1.0, %v1282_v14 }
 0x176   : > { %1283 = vrcp.f32 %v937_v15 }
 0x180   : > { %v1284_v16 = vpop.eup %1283 }
 0x181   : > { %940 = vst [vmem:[%s241_s26] sm:$0x1] %v1284_v16 }
 0x182   : > { %1328 = shalt.err (!%p1325_p1)
}
 0x183   : > { %s1329_s13 = scalar_lea.hbm %s1575_s8, 16  ;;  %s1333_s16 = scalar_lea.hbm %s1622_s5, 32 }
 0x184   : > { %p1330_p2 = scmp.ne.s32.totalorder %s1575_s8, %s1329_s13  ;;  %p1334_p9 = scmp.lt.u32.totalorder %s1575_s8, %s1622_s5 }
 0x185   : > { %p1335_p5 = scmp.lt.u32.totalorder %s1333_s16, %s1329_s13  ;;  %p1337_p10 = scmp.lt.u32.totalorder %s1329_s13, %s1575_s8 }
 0x186   : > { %p1331_p3 = pnand %p1330_p2, %p1635_p12 }
 0x187   : > { %p1336_p6 = por %p1335_p5, %p1334_p9 }
 0x188   : > { %p1332_p4 = pneg %p1331_p3 }
 0x189   : > { %p1338_p0 = por %p1337_p10, %p1336_p6 }
 0x18b   : > { %p1339_p7 = pnand %p1338_p0, %p1332_p4 }
 0x18d   : > { %1342 = shalt.err (!%p1339_p7)
}
 0x18e   : > { %1222 = dma.vmem_to_hbm [thread:$0]  (%p1635_p12), %s1577_s30, 16, %s1575_s8, %s942_s9  }
 0x18f PF: > { %p1239_p8 = scmp.ge.s32.totalorder %s1385_s21, 2  ;;  %s966_s25 = sand.u32 1, %s1373_s18  }
 0x190   : > { %p1636_p11 = scmp.ne.s32.totalorder %s1627_s29, 0  ;;  %s967_s26 = scalar_lea.sflag [#allocation3], %s966_s25 }
 0x192   : > { %p1232_p13 = pnand %p1239_p8, %p1636_p11 }
 0x194   : > { %1368 = dma.done.wait (!%p1232_p13), %s967_s26, 16  }
 0x195   : > { %1370 = vsyncadd (!%p1232_p13), %s967_s26, 4294967280  ;;  %p17_p1 = scmp.ge.s32.totalorder %s1449_s24, 4   ;;  %s1637_s18 = smov %s1377_s19 }
 0x196   : > { %s1638_s19 = smov %s1381_s20  ;;  %s1639_s20 = smov %s1460_s27 }
 0x197   : > { %s1640_s21 = smov %s1449_s24  ;;  %19 = sbr.rel (!%p17_p1) target bundleno = 5 (0x5), region = 84 }
 0x19e   :  { %971 = vsyncpa [#allocation3], 1 }
 0x19f   :  { %973 = vsyncpa [#allocation3 + $0x1], 1 }
 0x1a0   :  { %974 = vsyncpa [#allocation4], 1 }
 0x1a1   :  { %976 = vsyncpa [#allocation4 + $0x1], 1 }
 0x1a2   :  { %977 = vsyncpa [#allocation6], 1 }

</bundles_post_ra>
